<compile_context>
chip_gen: v5e
topology: v5e:2x2
jax: 0.10.0
libtpu: 0.0.40
codegen_flags: <defaults>
</compile_context>

<pallas_src>
import jax
import jax.numpy as jnp
from jax.experimental import pallas as pl
from jax.experimental.pallas import tpu as pltpu

_LANE = 128     # lane width of a vreg / last-dim tiling unit
_SUBLANE = 8    # sublane count / second-to-last-dim tiling unit


def _round_up(n, m):
    return ((n + m - 1) // m) * m


def _tensorcores_per_device():
    """How many TensorCores shard a 'parallel' grid axis on one device."""
    try:
        kind = jax.devices()[0].device_kind.lower()
    except Exception:
        return 1
    # v7x (2 TCs/chip) and the megacore chips (v4/v5p) split parallel grid
    # axes across 2 TensorCores; v5e/v6e run the grid as a loop on one TC.
    if "v7" in kind or "v4" in kind or "v5p" in kind:
        return 2
    return 1


def _mlp_kernel(x_ref, w2_ref, b2_ref, w3_ref, b3_ref, o_ref):
    # x_ref : (bm, D)    w2_ref: (D, Hp)   b2_ref: (1, Hp)
    # w3_ref: (Hp, H)    b3_ref: (1, H)    o_ref : (bm, H)
    x = x_ref[...]

    # l2(x) + ReLU   (MXU matmul with f32 accumulation; bias + relu on VPU)
    h = jnp.dot(x, w2_ref[...], preferred_element_type=jnp.float32)
    h = jnp.maximum(h + b2_ref[...], 0.0)

    # l3(relu(l2(x)))
    o = jnp.dot(h, w3_ref[...], preferred_element_type=jnp.float32)
    o_ref[...] = (o + b3_ref[...]).astype(o_ref.dtype)

    # TODO(synk): l1(x) + relu in the original module is dead code (its result
    # is immediately overwritten), so it is intentionally not computed here.


def prepare_params(w2, b2, w3, b3):
    """Pad the (tiny) weights ONCE.

    Weights are stored transposed vs. torch: w2 (D_in, H), w3 (H, H).
    The hidden dim is padded to a multiple of 128 so the intermediate
    activation is lane-dense in VMEM; padded hidden lanes see zero weight
    columns / bias, produce relu(0)=0, and hit zero w3 rows -> exact math.
    """
    D_in, H = w2.shape
    assert w3.shape == (H, H)
    assert D_in == H, "module applies l3 to a hidden vector -> needs D_in == H"

    Hp = _round_up(H, _LANE)
    w2_p = jnp.zeros((D_in, Hp), w2.dtype).at[:, :H].set(w2)
    b2_p = jnp.zeros((1, Hp), b2.dtype).at[0, :H].set(b2)
    w3_p = jnp.zeros((Hp, H), w3.dtype).at[:H, :].set(w3)
    b3_p = b3.reshape(1, H)
    return w2_p, b2_p, w3_p, b3_p


def nueral_net_forward(x, w2_p, b2_p, w3_p, b3_p):
    """y = relu(x @ w2 + b2) @ w3 + b3  (matches NueralNet.forward).

    Takes the pre-padded params from prepare_params(); x is (B, D_in) f32 and
    the result is (B, H) -- no activation padding, no post-slice.
    """
    B, D_in = x.shape
    Hp = w2_p.shape[1]
    H = w3_p.shape[1]
    assert w2_p.shape[0] == D_in

    # --- row-tile (block_m) selection ------------------------------------
    cap = 1024  # large tile: fewer ~0.35us grid steps, better HBM roofline
    num_tc = _tensorcores_per_device()
    if num_tc >= 2 and B >= 2 * _SUBLANE:
        # v7x / megacore: shard the parallel axis across both TensorCores;
        # prefer an even grid-step count so the cores stay balanced.
        bm = min(cap, _round_up(pl.cdiv(B, 2), _SUBLANE))
        steps = pl.cdiv(B, bm)
        if steps > 1 and steps % 2 == 1:
            bm = _round_up(pl.cdiv(B, steps + 1), _SUBLANE)
    else:
        # v5e/v6e: the grid is a sequential loop on one TC -- one big tile.
        bm = min(cap, _round_up(max(B, 1), _SUBLANE))

    grid = (pl.cdiv(B, bm),)  # ragged last block handled by Pallas (M dim only)

    return pl.pallas_call(
        _mlp_kernel,
        out_shape=jax.ShapeDtypeStruct((B, H), x.dtype),
        grid_spec=pltpu.PrefetchScalarGridSpec(
            num_scalar_prefetch=0,
            grid=grid,
            in_specs=[
                pl.BlockSpec((bm, D_in), lambda i: (i, 0)),  # x tile (streamed)
                pl.BlockSpec((D_in, Hp), lambda i: (0, 0)),  # W2 (resident)
                pl.BlockSpec((1, Hp), lambda i: (0, 0)),     # b2 (resident)
                pl.BlockSpec((Hp, H), lambda i: (0, 0)),     # W3 (resident)
                pl.BlockSpec((1, H), lambda i: (0, 0)),      # b3 (resident)
            ],
            out_specs=pl.BlockSpec((bm, H), lambda i: (i, 0)),
        ),
        compiler_params=pltpu.CompilerParams(
            dimension_semantics=("parallel",)),
    )(x, w2_p, b2_p, w3_p, b3_p)


def _reference(x, w2, b2, w3, b3):
    # Force full-precision matmuls so the comparison is against true f32 math.
    hp = jax.lax.Precision.HIGHEST
    h = jnp.maximum(jnp.dot(x, w2, precision=hp) + b2, 0.0)
    return jnp.dot(h, w3, precision=hp) + b3


if __name__ == "__main__":
    # Small shapes consistent with the module: input_size == hidden_size == 32.
    input_size = 32
    hidden_size = 32
    num_classes = 10  # unused by forward (as in the original module)

    key = jax.random.PRNGKey(0)
    kx1, kx2, k2w, k2b, k3w, k3b = jax.random.split(key, 6)

    # Deterministic parameter init (torch.nn.Linear-style uniform bounds),
    # stored transposed as (in_features, out_features).
    bound2 = 1.0 / jnp.sqrt(float(input_size))
    w2 = jax.random.uniform(k2w, (input_size, hidden_size),
                            minval=-bound2, maxval=bound2, dtype=jnp.float32)
    b2 = jax.random.uniform(k2b, (hidden_size,),
                            minval=-bound2, maxval=bound2, dtype=jnp.float32)

    bound3 = 1.0 / jnp.sqrt(float(input_size))  # l3 declared with input_size fan-in
    w3 = jax.random.uniform(k3w, (hidden_size, hidden_size),
                            minval=-bound3, maxval=bound3, dtype=jnp.float32)
    b3 = jax.random.uniform(k3b, (hidden_size,),
                            minval=-bound3, maxval=bound3, dtype=jnp.float32)

    # Weight padding happens exactly once, outside the per-call path.
    params = prepare_params(w2, b2, w3, b3)

    # Tolerance is loose enough to cover any MXU bf16-pass emulation of f32,
    # but still far below the scale of a real bug (missing bias/ReLU, etc.).
    tol = dict(atol=1e-2, rtol=1e-2)

    # Case 1: small aligned batch.
    x1 = jax.random.normal(kx1, (8, input_size), dtype=jnp.float32)
    out1 = jax.block_until_ready(nueral_net_forward(x1, *params))
    ref1 = _reference(x1, w2, b2, w3, b3)
    assert out1.shape == (8, hidden_size)
    assert jnp.allclose(out1, ref1, **tol), "mismatch (B=8)"

    # Case 2: batch not a multiple of the sublane tile -> ragged last block.
    x2 = jax.random.normal(kx2, (10, input_size), dtype=jnp.float32)
    out2 = jax.block_until_ready(nueral_net_forward(x2, *params))
    ref2 = _reference(x2, w2, b2, w3, b3)
    assert out2.shape == (10, hidden_size)
    assert jnp.allclose(out2, ref2, **tol), "mismatch (B=10)"

    print("KERNEL_OK")
</pallas_src>

<mosaic_0001>
module attributes {stable_mosaic.version = 11 : i64} {
  func.func @_mlp_kernel(%arg0: i32, %arg1: memref<8x32xf32, #tpu.memory_space<vmem>>, %arg2: memref<32x128xf32, #tpu.memory_space<vmem>>, %arg3: memref<1x128xf32, #tpu.memory_space<vmem>>, %arg4: memref<128x32xf32, #tpu.memory_space<vmem>>, %arg5: memref<1x32xf32, #tpu.memory_space<vmem>>, %arg6: memref<8x32xf32, #tpu.memory_space<vmem>>) attributes {dimension_semantics = [#tpu.dimension_semantics<parallel>], iteration_bounds = array<i64: 1>, scalar_prefetch = 0 : i64, scratch_operands = 0 : i64, tpu.core_type = #tpu.core_type<tc>, window_params = [{transform_indices = @transform_0, window_bounds = array<i64: 8, 32>}, {pipeline_mode = #tpu.pipeline_mode<synchronous>, transform_indices = @transform_1, window_bounds = array<i64: 32, 128>}, {pipeline_mode = #tpu.pipeline_mode<synchronous>, transform_indices = @transform_2, window_bounds = array<i64: 1, 128>}, {pipeline_mode = #tpu.pipeline_mode<synchronous>, transform_indices = @transform_3, window_bounds = array<i64: 128, 32>}, {pipeline_mode = #tpu.pipeline_mode<synchronous>, transform_indices = @transform_4, window_bounds = array<i64: 1, 32>}, {transform_indices = @transform_5, window_bounds = array<i64: 8, 32>}]} {
    %c0 = arith.constant 0 : index
    %c0_0 = arith.constant 0 : index
    %0 = vector.load %arg1[%c0, %c0_0] : memref<8x32xf32, #tpu.memory_space<vmem>>, vector<8x32xf32>
    %c0_1 = arith.constant 0 : index
    %c0_2 = arith.constant 0 : index
    %1 = vector.load %arg2[%c0_1, %c0_2] : memref<32x128xf32, #tpu.memory_space<vmem>>, vector<32x128xf32>
    %cst = arith.constant dense<0.000000e+00> : vector<8x128xf32>
    %2 = tpu.matmul %0, %1, %cst {dimension_numbers = #tpu.dot_dimension_numbers<[1], [0], [0], [1], [0, 0, 1, 1], [], []>} : vector<8x32xf32>, vector<32x128xf32>, vector<8x128xf32> -> vector<8x128xf32>
    %c0_3 = arith.constant 0 : index
    %c0_4 = arith.constant 0 : index
    %3 = vector.load %arg3[%c0_3, %c0_4] : memref<1x128xf32, #tpu.memory_space<vmem>>, vector<1x128xf32>
    %4 = vector.broadcast %3 : vector<1x128xf32> to vector<8x128xf32>
    %5 = arith.addf %2, %4 : vector<8x128xf32>
    %cst_5 = arith.constant 0.000000e+00 : f32
    %6 = vector.broadcast %cst_5 : f32 to vector<8x128xf32>
    %7 = arith.maximumf %5, %6 : vector<8x128xf32>
    %c0_6 = arith.constant 0 : index
    %c0_7 = arith.constant 0 : index
    %8 = vector.load %arg4[%c0_6, %c0_7] : memref<128x32xf32, #tpu.memory_space<vmem>>, vector<128x32xf32>
    %cst_8 = arith.constant dense<0.000000e+00> : vector<8x32xf32>
    %9 = tpu.matmul %7, %8, %cst_8 {dimension_numbers = #tpu.dot_dimension_numbers<[1], [0], [0], [1], [0, 0, 1, 1], [], []>} : vector<8x128xf32>, vector<128x32xf32>, vector<8x32xf32> -> vector<8x32xf32>
    %c0_9 = arith.constant 0 : index
    %c0_10 = arith.constant 0 : index
    %10 = vector.load %arg5[%c0_9, %c0_10] : memref<1x32xf32, #tpu.memory_space<vmem>>, vector<1x32xf32>
    %11 = vector.broadcast %10 : vector<1x32xf32> to vector<8x32xf32>
    %12 = arith.addf %9, %11 : vector<8x32xf32>
    %c0_11 = arith.constant 0 : index
    %c0_12 = arith.constant 0 : index
    %13 = vector.load %arg6[%c0_11, %c0_12] : memref<8x32xf32, #tpu.memory_space<vmem>>, vector<8x32xf32>
    tpu.vector_store %arg6[%c0_11, %c0_12], %12 {strides = array<i32>} : memref<8x32xf32, #tpu.memory_space<vmem>>, vector<8x32xf32>,
    return
  }
  func.func @transform_0(%arg0: i32) -> (i32, i32) {
    %c0_i32 = arith.constant 0 : i32
    %c0_i32_0 = arith.constant 0 : i32
    return %arg0, %c0_i32 : i32, i32
  }
  func.func @transform_1(%arg0: i32) -> (i32, i32) {
    %c0_i32 = arith.constant 0 : i32
    %c0_i32_0 = arith.constant 0 : i32
    %c0_i32_1 = arith.constant 0 : i32
    return %c0_i32, %c0_i32_0 : i32, i32
  }
  func.func @transform_2(%arg0: i32) -> (i32, i32) {
    %c0_i32 = arith.constant 0 : i32
    %c0_i32_0 = arith.constant 0 : i32
    %c0_i32_1 = arith.constant 0 : i32
    return %c0_i32, %c0_i32_0 : i32, i32
  }
  func.func @transform_3(%arg0: i32) -> (i32, i32) {
    %c0_i32 = arith.constant 0 : i32
    %c0_i32_0 = arith.constant 0 : i32
    %c0_i32_1 = arith.constant 0 : i32
    return %c0_i32, %c0_i32_0 : i32, i32
  }
  func.func @transform_4(%arg0: i32) -> (i32, i32) {
    %c0_i32 = arith.constant 0 : i32
    %c0_i32_0 = arith.constant 0 : i32
    %c0_i32_1 = arith.constant 0 : i32
    return %c0_i32, %c0_i32_0 : i32, i32
  }
  func.func @transform_5(%arg0: i32) -> (i32, i32) {
    %c0_i32 = arith.constant 0 : i32
    %c0_i32_0 = arith.constant 0 : i32
    return %arg0, %c0_i32 : i32, i32
  }
}

</mosaic_0001>

<bundles_post_ra>
// kernel: tpu_custom_call.1
= control target key start
LH: loop header
LB: loop body
LE: loop exit
PB: predicated region body
PF: predicated region fallthrough
CT: control target
= control target key end

     0   :  { %vm30_vm0 = vcmask 261120   ;;  %s247_s0 = inlined_call_operand.vmem [shape: f32[8,32], index: 0, kind: input, shape index: {}]   ;;  %s248_s1 = inlined_call_operand.vmem [shape: f32[32,128], index: 1, kind: input, shape index: {}]   ;;  %s249_s2 = inlined_call_operand.vmem [shape: f32[1,128], index: 2, kind: input, shape index: {}]   ;;  %s250_s3 = inlined_call_operand.vmem [shape: f32[128,32], index: 3, kind: input, shape index: {}]   ;;  %s251_s4 = inlined_call_operand.vmem [shape: f32[1,32], index: 4, kind: input, shape index: {}]   ;;  %s252_s5 = inlined_call_operand.hbm [shape: f32[8,32], index: 5, kind: output, shape index: {}]  }
   0x1   :  { %v25_v0 = vld [vmem:[%s248_s1 + $0x18] sm:$0xff]  ;;  %v24_v1 = vld [vmem:[%s248_s1 + $0x10] sm:$0xff]  ;;  %v23_v3 = vld [vmem:[%s248_s1 + $0x8] sm:$0xff] }
   0x2   :  { %46 = vmatpush.msra.mxu0 %v25_v0  ;;  %v70_v2 = vld [vmem:[%s250_s3 + $0x78] sm:$0xff]  ;;  %v69_v4 = vld [vmem:[%s250_s3 + $0x70] sm:$0xff]  ;;  %v68_v5 = vld [vmem:[%s250_s3 + $0x68] sm:$0xff] }
   0x3   :  { %75 = vmatpush.msra.mxu1 %v70_v2  ;;  %v22_v6 = vld [vmem:[%s248_s1] sm:$0xff]  ;;  %v66_v9 = vld [vmem:[%s250_s3 + $0x58] sm:$0xff] }
   0x4   :  { %47 = vmatpush.msra.mxu0 %v24_v1  ;;  %v21_v7 = vld [vmem:[%s247_s0] sm:$0xff] }
   0x5   :  { %76 = vmatpush.msra.mxu1 %v69_v4  ;;  %v67_v8 = vld [vmem:[%s250_s3 + $0x60] sm:$0xff] }
   0x6   :  { %48 = vmatpush.msra.mxu0 %v23_v3 }
   0x7   :  { %77 = vmatpush.msra.mxu1 %v68_v5 }
   0x8   :  { %49 = vmatpush.msra.mxu0 %v22_v6 }
   0x9   :  { %10 = vsyncpa [#allocation3], 0  ;;  %112 = vmatmul.msk.f32.vlgmr.msra.gmra.mxu0 %vm30_vm0, %v21_v7  ;;  %78 = vmatpush.msra.mxu1 %v67_v8  ;;  %v65_v10 = vld [vmem:[%s250_s3 + $0x50] sm:$0xff]  ;;  %v64_v11 = vld [vmem:[%s250_s3 + $0x48] sm:$0xff]  ;;  %s142_s12 = smov [#allocation2]   ;;  %s103_s14 = sshll.u32 %s252_s5, 4  ;;  %s104_s14 = int_to_ptr.hbm [resolvable:$true] %s103_s14 }
   0xa   :  { %v63_v12 = vld [vmem:[%s250_s3 + $0x40] sm:$0xff]  ;;  %v62_v13 = vld [vmem:[%s250_s3 + $0x38] sm:$0xff]  ;;  %v61_v14 = vld [vmem:[%s250_s3 + $0x30] sm:$0xff]  ;;  %s101_s1 = sshll.u32 %s142_s12, 4  ;;  %s102_s1 = int_to_ptr.vmem [resolvable:$true] %s101_s1 }
   0xb   :  { %79 = vmatpush.msra.mxu1 %v66_v9  ;;  %v60_v15 = vld [vmem:[%s250_s3 + $0x28] sm:$0xff]  ;;  %v59_v16 = vld [vmem:[%s250_s3 + $0x20] sm:$0xff]  ;;  %v58_v17 = vld [vmem:[%s250_s3 + $0x18] sm:$0xff] }
   0xc   :  { %v57_v18 = vld [vmem:[%s250_s3 + $0x10] sm:$0xff]  ;;  %v56_v19 = vld [vmem:[%s250_s3 + $0x8] sm:$0xff]  ;;  %v55_v20 = vld [vmem:[%s250_s3] sm:$0xff] }
   0xd   :  { %80 = vmatpush.msra.mxu1 %v65_v10  ;;  %v114_v21 = vld [vmem:[%s249_s2] ss:$0 sm:$0xff] }
   0xe   :  { %v115_v25 = vld [vmem:[%s251_s4] ss:$0 sm:$0xff] }
   0xf   :  { %81 = vmatpush.msra.mxu1 %v64_v11 }
  0x11   :  { %82 = vmatpush.msra.mxu1 %v63_v12 }
  0x13   :  { %83 = vmatpush.msra.mxu1 %v62_v13 }
  0x15   :  { %84 = vmatpush.msra.mxu1 %v61_v14 }
  0x17   :  { %85 = vmatpush.msra.mxu1 %v60_v15 }
  0x19   :  { %86 = vmatpush.msra.mxu1 %v59_v16 }
  0x1b   :  { %87 = vmatpush.msra.mxu1 %v58_v17 }
  0x1d   :  { %88 = vmatpush.msra.mxu1 %v57_v18 }
  0x1f   :  { %89 = vmatpush.msra.mxu1 %v56_v19 }
  0x21   :  { %90 = vmatpush.msra.mxu1 %v55_v20 }
  0x86   :  { %v51_v22 = vpop.f32.mrf.mxu0 }
  0x87   :  { %v52_v23 = vadd.f32 %v114_v21, %v51_v22 }
  0x89   :  { %v54_v24 = vmax.f32 %v52_v23, 0.0 }
  0x8b   :  { %91 = vmatmul.f32.vlgmr.msra.gmra.mxu1 %v54_v24 }
 0x108   :  { %v92_v26 = vpop.f32.mrf.mxu1 }
 0x109   :  { %v93_v27 = vadd.f32 %v115_v25, %v92_v26 }
 0x10b   :  { %95 = vst.msk [vmem:[#allocation2] sm:$0xff] %vm30_vm0, %v93_v27 }
 0x10c   :  { %106 = dma.vmem_to_hbm [thread:$0]  %s102_s1, 128, %s104_s14, [#allocation3]  }
 0x10d   :  { %140 = dma.done.wait [#allocation3], 128  }
 0x10e   :  { %141 = vsyncadd [#allocation3], 4294967168 }
 0x10f   :  { %111 = vsyncpa [#allocation3], 1 }

</bundles_post_ra>
